<compile_context>
chip_gen: v6e
topology: v6e:2x2x1
jax: 0.10.0
libtpu: 0.0.40
codegen_flags: <defaults>
</compile_context>

<pallas_src>
import math
import functools

import jax
import jax.numpy as jnp
from jax import lax
from jax.experimental import pallas as pl
from jax.experimental.pallas import tpu as pltpu

LN_EPS = 1e-5                      # torch.nn.LayerNorm default
_INV_SQRT2 = 0.7071067811865476
_GELU_TANH_APPROX = True           # tanh GELU -> EUP slot; False -> exact erf (torch default)


def _round_up(n, m):
    return ((n + m - 1) // m) * m


def _detect_buffered_blockspec():
    """True iff BlockSpec(pipeline_mode=pl.Buffered(1)) works end-to-end (probed once)."""
    if not hasattr(pl, "Buffered"):
        return False
    try:
        const_spec = pl.BlockSpec((8, 128), lambda i: (0, 0), pipeline_mode=pl.Buffered(1))
    except TypeError:
        return False
    try:
        def _probe(x_ref, o_ref):
            o_ref[...] = x_ref[...]

        fn = pl.pallas_call(
            _probe,
            out_shape=jax.ShapeDtypeStruct((16, 128), jnp.float32),
            grid_spec=pltpu.PrefetchScalarGridSpec(
                num_scalar_prefetch=0,
                grid=(2,),
                in_specs=[const_spec],
                out_specs=pl.BlockSpec((8, 128), lambda i: (i, 0)),
            ),
        )
        jax.block_until_ready(fn(jnp.zeros((8, 128), jnp.float32)))
        return True
    except Exception:
        # Probe only: a failure here just disables the single-buffering optimization.
        return False


def _query_vmem_capacity_bytes():
    try:
        return int(pltpu.get_tpu_info().vmem_capacity_bytes)
    except Exception:
        return 64 << 20            # conservative: v7x per-TensorCore VMEM


_HAS_BUFFERED = _detect_buffered_blockspec()
_VMEM_CAPACITY = _query_vmem_capacity_bytes()


def _ffn_kernel(x_ref, gamma_ref, beta_ref, w1_ref, b1_ref, w2_ref, b2_ref, o_ref,
                *, true_dim):
    # x_ref: (tile_n, dim_p) bf16 tile of tokens; padded lanes/rows are zero.
    x = x_ref[...].astype(jnp.float32)
    inv_d = 1.0 / float(true_dim)

    # --- one-pass LayerNorm statistics (padded lanes are zero -> sums are exact;
    #     divide by the TRUE feature dim, not the padded one) ---
    s1 = jnp.sum(x, axis=-1, keepdims=True)
    s2 = jnp.sum(x * x, axis=-1, keepdims=True)
    mean = s1 * inv_d
    var = jnp.maximum(s2 * inv_d - mean * mean, 0.0)
    inv_std = lax.rsqrt(var + LN_EPS)
    # gamma/beta are zero-padded, so xn is exactly zero on padded lanes.
    xn = (x - mean) * inv_std * gamma_ref[...] + beta_ref[...]

    # --- Linear(dim -> hidden): bf16 MXU inputs, f32 accumulation, f32 bias add ---
    h = jnp.dot(xn.astype(jnp.bfloat16), w1_ref[...],
                preferred_element_type=jnp.float32) + b1_ref[...]

    # --- GELU in f32 (tanh approximation by default -> EUP; exact erf otherwise) ---
    if _GELU_TANH_APPROX:
        h = jax.nn.gelu(h, approximate=True)
    else:
        h = 0.5 * h * (1.0 + lax.erf(h * _INV_SQRT2))

    # --- Linear(hidden -> dim) ---
    out = jnp.dot(h.astype(jnp.bfloat16), w2_ref[...],
                  preferred_element_type=jnp.float32) + b2_ref[...]

    o_ref[...] = out.astype(o_ref.dtype)


def pack_ffn_params(gamma, beta, w1, b1, w2, b2):
    """One-time packing (do this at model init): zero-pad feature/hidden dims to
    multiples of 128 and store the weight matrices in bf16."""
    dim, hidden = w1.shape
    dim_p, hidden_p = _round_up(dim, 128), _round_up(hidden, 128)
    f32 = jnp.float32
    gamma_p = jnp.pad(gamma.astype(f32), (0, dim_p - dim)).reshape(1, dim_p)
    beta_p = jnp.pad(beta.astype(f32), (0, dim_p - dim)).reshape(1, dim_p)
    w1_p = jnp.pad(w1.astype(f32), ((0, dim_p - dim), (0, hidden_p - hidden))).astype(jnp.bfloat16)
    b1_p = jnp.pad(b1.astype(f32), (0, hidden_p - hidden)).reshape(1, hidden_p)
    w2_p = jnp.pad(w2.astype(f32), ((0, hidden_p - hidden), (0, dim_p - dim))).astype(jnp.bfloat16)
    b2_p = jnp.pad(b2.astype(f32), (0, dim_p - dim)).reshape(1, dim_p)
    return gamma_p, beta_p, w1_p, b1_p, w2_p, b2_p


@jax.jit
def feed_forward(x, gamma_p, beta_p, w1_p, b1_p, w2_p, b2_p):
    """FeedForward(dim, hidden) forward on pre-packed params.  x: (B, N, dim)."""
    B, N, dim = x.shape
    dim_p = gamma_p.shape[-1]
    hidden_p = b1_p.shape[-1]
    tokens = B * N

    weight_copies = 1 if _HAS_BUFFERED else 2      # constants single-buffered if supported

    def footprint(tn):                             # VMEM bytes for one grid step
        wb = weight_copies * 2 * dim_p * hidden_p * 2        # w1 + w2 (bf16)
        vb = weight_copies * (3 * dim_p + hidden_p) * 4      # gamma, beta, b1, b2 (f32)
        io = 2 * 2 * tn * dim_p * 2                          # bf16 in/out tiles, 2 bufs each
        im = tn * (hidden_p + 3 * dim_p) * 4                 # f32 live intermediates
        return wb + vb + io + im

    budget = int(0.75 * _VMEM_CAPACITY)            # headroom for Mosaic internal scratch
    max_tile = 512
    while max_tile > 64 and int(1.3 * footprint(max_tile)) > budget:
        max_tile //= 2

    n_tiles = pl.cdiv(tokens, max_tile)
    if tokens >= 16:
        # >= 2 (even) grid steps so the "parallel" axis shards across both v7x TCs,
        # and the tile size divides the token count as evenly as possible.
        n_tiles = _round_up(max(n_tiles, 2), 2)
    tile_n = _round_up(pl.cdiv(tokens, n_tiles), 16)   # bf16-friendly sublane multiple
    tokens_p = tile_n * n_tiles

    vmem_limit = min(budget, max(int(1.3 * footprint(tile_n)), 32 * 1024 * 1024))

    # Lane-dense, zero-padded bf16 token slab.
    x2d = jnp.pad(x.reshape(tokens, dim).astype(jnp.bfloat16),
                  ((0, tokens_p - tokens), (0, dim_p - dim)))

    const_kw = dict(pipeline_mode=pl.Buffered(1)) if _HAS_BUFFERED else {}
    kernel = functools.partial(_ffn_kernel, true_dim=dim)

    out2d = pl.pallas_call(
        kernel,
        out_shape=jax.ShapeDtypeStruct((tokens_p, dim_p), jnp.bfloat16),
        grid_spec=pltpu.PrefetchScalarGridSpec(
            num_scalar_prefetch=0,
            grid=(n_tiles,),
            in_specs=[
                pl.BlockSpec((tile_n, dim_p), lambda i: (i, 0)),                 # x tile (bf16)
                pl.BlockSpec((1, dim_p), lambda i: (0, 0), **const_kw),          # gamma (f32)
                pl.BlockSpec((1, dim_p), lambda i: (0, 0), **const_kw),          # beta  (f32)
                pl.BlockSpec((dim_p, hidden_p), lambda i: (0, 0), **const_kw),   # w1 (bf16)
                pl.BlockSpec((1, hidden_p), lambda i: (0, 0), **const_kw),       # b1 (f32)
                pl.BlockSpec((hidden_p, dim_p), lambda i: (0, 0), **const_kw),   # w2 (bf16)
                pl.BlockSpec((1, dim_p), lambda i: (0, 0), **const_kw),          # b2 (f32)
            ],
            out_specs=pl.BlockSpec((tile_n, dim_p), lambda i: (i, 0)),
        ),
        compiler_params=pltpu.CompilerParams(
            dimension_semantics=("parallel",),     # token axis shards across TensorCores
            vmem_limit_bytes=vmem_limit,
        ),
    )(x2d, gamma_p, beta_p, w1_p, b1_p, w2_p, b2_p)

    return out2d[:tokens, :dim].reshape(B, N, dim).astype(x.dtype)


def _reference(x, gamma, beta, w1, b1, w2, b2):
    xf = x.astype(jnp.float32)
    mean = jnp.mean(xf, axis=-1, keepdims=True)
    var = jnp.mean((xf - mean) ** 2, axis=-1, keepdims=True)
    xn = (xf - mean) * lax.rsqrt(var + LN_EPS) * gamma + beta
    h = xn @ w1 + b1
    h = 0.5 * h * (1.0 + lax.erf(h * _INV_SQRT2))     # exact (torch-default) GELU
    return (h @ w2 + b2).astype(x.dtype)


def _make_params(key, dim, hidden):
    k_g, k_b, k_w1, k_b1, k_w2, k_b2 = jax.random.split(key, 6)
    gamma = jnp.ones((dim,), jnp.float32) + 0.01 * jax.random.normal(k_g, (dim,))
    beta = 0.01 * jax.random.normal(k_b, (dim,), dtype=jnp.float32)
    w1 = jax.random.normal(k_w1, (dim, hidden), dtype=jnp.float32) / math.sqrt(dim)
    b1 = 0.01 * jax.random.normal(k_b1, (hidden,), dtype=jnp.float32)
    w2 = jax.random.normal(k_w2, (hidden, dim), dtype=jnp.float32) / math.sqrt(hidden)
    b2 = 0.01 * jax.random.normal(k_b2, (dim,), dtype=jnp.float32)
    return gamma, beta, w1, b1, w2, b2


if __name__ == "__main__":
    key = jax.random.PRNGKey(0)
    k_p1, k_x1, k_p2, k_x2 = jax.random.split(key, 4)

    # bf16 token I/O + bf16 MXU inputs (f32 accumulation / LN / GELU) vs f32 reference.
    TOL = dict(atol=1e-1, rtol=5e-2)

    # Test 1: SimpleViT-small-like FFN (dim=128, mlp_dim=256, 2 x 64 tokens).
    B, N, dim, hidden = 2, 64, 128, 256
    params = _make_params(k_p1, dim, hidden)
    packed = pack_ffn_params(*params)          # one-time weight packing (model init)
    x = jax.random.normal(k_x1, (B, N, dim), dtype=jnp.float32)
    out = jax.block_until_ready(feed_forward(x, *packed))
    ref = _reference(x, *params)
    assert out.shape == (B, N, dim)
    err = float(jnp.max(jnp.abs(out - ref)))
    assert jnp.allclose(out, ref, **TOL), f"mismatch vs reference (max abs err {err:.4e})"

    # Test 2: non-lane-aligned dims + ragged token count exercise the padding path.
    B2, N2, dim2, hidden2 = 2, 50, 48, 80
    params2 = _make_params(k_p2, dim2, hidden2)
    packed2 = pack_ffn_params(*params2)
    x2 = jax.random.normal(k_x2, (B2, N2, dim2), dtype=jnp.float32)
    out2 = jax.block_until_ready(feed_forward(x2, *packed2))
    ref2 = _reference(x2, *params2)
    assert out2.shape == (B2, N2, dim2)
    err2 = float(jnp.max(jnp.abs(out2 - ref2)))
    assert jnp.allclose(out2, ref2, **TOL), f"mismatch vs reference (max abs err {err2:.4e})"

    print("KERNEL_OK")
</pallas_src>

<mosaic_0001>
module attributes {stable_mosaic.version = 11 : i64} {
  func.func @_probe(%arg0: i32, %arg1: memref<8x128xf32, #tpu.memory_space<vmem>>, %arg2: memref<8x128xf32, #tpu.memory_space<vmem>>) attributes {dimension_semantics = [#tpu.dimension_semantics<arbitrary>], iteration_bounds = array<i64: 2>, scalar_prefetch = 0 : i64, scratch_operands = 0 : i64, tpu.core_type = #tpu.core_type<tc>, window_params = [{pipeline_mode = #tpu.pipeline_mode<synchronous>, transform_indices = @transform_0, window_bounds = array<i64: 8, 128>}, {transform_indices = @transform_1, window_bounds = array<i64: 8, 128>}]} {
    %c0 = arith.constant 0 : index
    %c0_0 = arith.constant 0 : index
    %0 = vector.load %arg1[%c0, %c0_0] : memref<8x128xf32, #tpu.memory_space<vmem>>, vector<8x128xf32>
    %c0_1 = arith.constant 0 : index
    %c0_2 = arith.constant 0 : index
    %1 = vector.load %arg2[%c0_1, %c0_2] : memref<8x128xf32, #tpu.memory_space<vmem>>, vector<8x128xf32>
    tpu.vector_store %arg2[%c0_1, %c0_2], %0 {strides = array<i32>} : memref<8x128xf32, #tpu.memory_space<vmem>>, vector<8x128xf32>,
    return
  }
  func.func @transform_0(%arg0: i32) -> (i32, i32) {
    %c0_i32 = arith.constant 0 : i32
    %c0_i32_0 = arith.constant 0 : i32
    %c0_i32_1 = arith.constant 0 : i32
    return %c0_i32, %c0_i32_0 : i32, i32
  }
  func.func @transform_1(%arg0: i32) -> (i32, i32) {
    %c0_i32 = arith.constant 0 : i32
    %c0_i32_0 = arith.constant 0 : i32
    return %arg0, %c0_i32 : i32, i32
  }
}

module attributes {stable_mosaic.version = 11 : i64} {
  func.func @_ffn_kernel(%arg0: i32, %arg1: memref<64x128xbf16, #tpu.memory_space<vmem>>, %arg2: memref<1x128xf32, #tpu.memory_space<vmem>>, %arg3: memref<1x128xf32, #tpu.memory_space<vmem>>, %arg4: memref<128x256xbf16, #tpu.memory_space<vmem>>, %arg5: memref<1x256xf32, #tpu.memory_space<vmem>>, %arg6: memref<256x128xbf16, #tpu.memory_space<vmem>>, %arg7: memref<1x128xf32, #tpu.memory_space<vmem>>, %arg8: memref<64x128xbf16, #tpu.memory_space<vmem>>) attributes {dimension_semantics = [#tpu.dimension_semantics<parallel>], iteration_bounds = array<i64: 2>, scalar_prefetch = 0 : i64, scratch_operands = 0 : i64, tpu.core_type = #tpu.core_type<tc>, window_params = [{transform_indices = @transform_0, window_bounds = array<i64: 64, 128>}, {pipeline_mode = #tpu.pipeline_mode<synchronous>, transform_indices = @transform_1, window_bounds = array<i64: 1, 128>}, {pipeline_mode = #tpu.pipeline_mode<synchronous>, transform_indices = @transform_2, window_bounds = array<i64: 1, 128>}, {pipeline_mode = #tpu.pipeline_mode<synchronous>, transform_indices = @transform_3, window_bounds = array<i64: 128, 256>}, {pipeline_mode = #tpu.pipeline_mode<synchronous>, transform_indices = @transform_4, window_bounds = array<i64: 1, 256>}, {pipeline_mode = #tpu.pipeline_mode<synchronous>, transform_indices = @transform_5, window_bounds = array<i64: 256, 128>}, {pipeline_mode = #tpu.pipeline_mode<synchronous>, transform_indices = @transform_6, window_bounds = array<i64: 1, 128>}, {transform_indices = @transform_7, window_bounds = array<i64: 64, 128>}]} {
    %c0 = arith.constant 0 : index
    %c0_0 = arith.constant 0 : index
    %0 = vector.load %arg1[%c0, %c0_0] : memref<64x128xbf16, #tpu.memory_space<vmem>>, vector<64x128xbf16>
    %1 = arith.extf %0 : vector<64x128xbf16> to vector<64x128xf32>
    %cst = arith.constant dense<0.000000e+00> : vector<64xf32>
    %2 = vector.multi_reduction <add>, %1, %cst [1] : vector<64x128xf32> to vector<64xf32>
    %3 = vector.shape_cast %2 : vector<64xf32> to vector<64x1xf32>
    %4 = arith.mulf %1, %1 : vector<64x128xf32>
    %cst_1 = arith.constant dense<0.000000e+00> : vector<64xf32>
    %5 = vector.multi_reduction <add>, %4, %cst_1 [1] : vector<64x128xf32> to vector<64xf32>
    %6 = vector.shape_cast %5 : vector<64xf32> to vector<64x1xf32>
    %cst_2 = arith.constant 7.812500e-03 : f32
    %7 = vector.broadcast %cst_2 : f32 to vector<64x1xf32>
    %8 = arith.mulf %3, %7 : vector<64x1xf32>
    %cst_3 = arith.constant 7.812500e-03 : f32
    %9 = vector.broadcast %cst_3 : f32 to vector<64x1xf32>
    %10 = arith.mulf %6, %9 : vector<64x1xf32>
    %11 = arith.mulf %8, %8 : vector<64x1xf32>
    %12 = arith.subf %10, %11 : vector<64x1xf32>
    %cst_4 = arith.constant 0.000000e+00 : f32
    %13 = vector.broadcast %cst_4 : f32 to vector<64x1xf32>
    %14 = arith.maximumf %12, %13 : vector<64x1xf32>
    %cst_5 = arith.constant 9.99999974E-6 : f32
    %15 = vector.broadcast %cst_5 : f32 to vector<64x1xf32>
    %16 = arith.addf %14, %15 : vector<64x1xf32>
    %17 = math.rsqrt %16 : vector<64x1xf32>
    %18 = vector.broadcast %8 : vector<64x1xf32> to vector<64x128xf32>
    %19 = arith.subf %1, %18 : vector<64x128xf32>
    %20 = vector.broadcast %17 : vector<64x1xf32> to vector<64x128xf32>
    %21 = arith.mulf %19, %20 : vector<64x128xf32>
    %c0_6 = arith.constant 0 : index
    %c0_7 = arith.constant 0 : index
    %22 = vector.load %arg2[%c0_6, %c0_7] : memref<1x128xf32, #tpu.memory_space<vmem>>, vector<1x128xf32>
    %23 = vector.broadcast %22 : vector<1x128xf32> to vector<64x128xf32>
    %24 = arith.mulf %21, %23 : vector<64x128xf32>
    %c0_8 = arith.constant 0 : index
    %c0_9 = arith.constant 0 : index
    %25 = vector.load %arg3[%c0_8, %c0_9] : memref<1x128xf32, #tpu.memory_space<vmem>>, vector<1x128xf32>
    %26 = vector.broadcast %25 : vector<1x128xf32> to vector<64x128xf32>
    %27 = arith.addf %24, %26 : vector<64x128xf32>
    %28 = arith.truncf %27 : vector<64x128xf32> to vector<64x128xbf16>
    %c0_10 = arith.constant 0 : index
    %c0_11 = arith.constant 0 : index
    %29 = vector.load %arg4[%c0_10, %c0_11] : memref<128x256xbf16, #tpu.memory_space<vmem>>, vector<128x256xbf16>
    %cst_12 = arith.constant dense<0.000000e+00> : vector<64x256xf32>
    %30 = tpu.matmul %28, %29, %cst_12 {dimension_numbers = #tpu.dot_dimension_numbers<[1], [0], [0], [1], [0, 0, 1, 1], [], []>} : vector<64x128xbf16>, vector<128x256xbf16>, vector<64x256xf32> -> vector<64x256xf32>
    %c0_13 = arith.constant 0 : index
    %c0_14 = arith.constant 0 : index
    %31 = vector.load %arg5[%c0_13, %c0_14] : memref<1x256xf32, #tpu.memory_space<vmem>>, vector<1x256xf32>
    %32 = vector.broadcast %31 : vector<1x256xf32> to vector<64x256xf32>
    %33 = arith.addf %30, %32 : vector<64x256xf32>
    %34 = arith.mulf %33, %33 : vector<64x256xf32>
    %35 = arith.mulf %33, %34 : vector<64x256xf32>
    %cst_15 = arith.constant 4.471500e-02 : f32
    %36 = vector.broadcast %cst_15 : f32 to vector<64x256xf32>
    %37 = arith.mulf %36, %35 : vector<64x256xf32>
    %38 = arith.addf %33, %37 : vector<64x256xf32>
    %cst_16 = arith.constant 0.797884583 : f32
    %39 = vector.broadcast %cst_16 : f32 to vector<64x256xf32>
    %40 = arith.mulf %39, %38 : vector<64x256xf32>
    %41 = math.tanh %40 : vector<64x256xf32>
    %cst_17 = arith.constant 1.000000e+00 : f32
    %42 = vector.broadcast %cst_17 : f32 to vector<64x256xf32>
    %43 = arith.addf %42, %41 : vector<64x256xf32>
    %cst_18 = arith.constant 5.000000e-01 : f32
    %44 = vector.broadcast %cst_18 : f32 to vector<64x256xf32>
    %45 = arith.mulf %44, %43 : vector<64x256xf32>
    %46 = arith.mulf %33, %45 : vector<64x256xf32>
    %47 = arith.truncf %46 : vector<64x256xf32> to vector<64x256xbf16>
    %c0_19 = arith.constant 0 : index
    %c0_20 = arith.constant 0 : index
    %48 = vector.load %arg6[%c0_19, %c0_20] : memref<256x128xbf16, #tpu.memory_space<vmem>>, vector<256x128xbf16>
    %cst_21 = arith.constant dense<0.000000e+00> : vector<64x128xf32>
    %49 = tpu.matmul %47, %48, %cst_21 {dimension_numbers = #tpu.dot_dimension_numbers<[1], [0], [0], [1], [0, 0, 1, 1], [], []>} : vector<64x256xbf16>, vector<256x128xbf16>, vector<64x128xf32> -> vector<64x128xf32>
    %c0_22 = arith.constant 0 : index
    %c0_23 = arith.constant 0 : index
    %50 = vector.load %arg7[%c0_22, %c0_23] : memref<1x128xf32, #tpu.memory_space<vmem>>, vector<1x128xf32>
    %51 = vector.broadcast %50 : vector<1x128xf32> to vector<64x128xf32>
    %52 = arith.addf %49, %51 : vector<64x128xf32>
    %53 = arith.truncf %52 : vector<64x128xf32> to vector<64x128xbf16>
    %c0_24 = arith.constant 0 : index
    %c0_25 = arith.constant 0 : index
    %54 = vector.load %arg8[%c0_24, %c0_25] : memref<64x128xbf16, #tpu.memory_space<vmem>>, vector<64x128xbf16>
    tpu.vector_store %arg8[%c0_24, %c0_25], %53 {strides = array<i32>} : memref<64x128xbf16, #tpu.memory_space<vmem>>, vector<64x128xbf16>,
    return
  }
  func.func @transform_0(%arg0: i32) -> (i32, i32) {
    %c0_i32 = arith.constant 0 : i32
    %c0_i32_0 = arith.constant 0 : i32
    return %arg0, %c0_i32 : i32, i32
  }
  func.func @transform_1(%arg0: i32) -> (i32, i32) {
    %c0_i32 = arith.constant 0 : i32
    %c0_i32_0 = arith.constant 0 : i32
    %c0_i32_1 = arith.constant 0 : i32
    return %c0_i32, %c0_i32_0 : i32, i32
  }
  func.func @transform_2(%arg0: i32) -> (i32, i32) {
    %c0_i32 = arith.constant 0 : i32
    %c0_i32_0 = arith.constant 0 : i32
    %c0_i32_1 = arith.constant 0 : i32
    return %c0_i32, %c0_i32_0 : i32, i32
  }
  func.func @transform_3(%arg0: i32) -> (i32, i32) {
    %c0_i32 = arith.constant 0 : i32
    %c0_i32_0 = arith.constant 0 : i32
    %c0_i32_1 = arith.constant 0 : i32
    return %c0_i32, %c0_i32_0 : i32, i32
  }
  func.func @transform_4(%arg0: i32) -> (i32, i32) {
    %c0_i32 = arith.constant 0 : i32
    %c0_i32_0 = arith.constant 0 : i32
    %c0_i32_1 = arith.constant 0 : i32
    return %c0_i32, %c0_i32_0 : i32, i32
  }
  func.func @transform_5(%arg0: i32) -> (i32, i32) {
    %c0_i32 = arith.constant 0 : i32
    %c0_i32_0 = arith.constant 0 : i32
    %c0_i32_1 = arith.constant 0 : i32
    return %c0_i32, %c0_i32_0 : i32, i32
  }
  func.func @transform_6(%arg0: i32) -> (i32, i32) {
    %c0_i32 = arith.constant 0 : i32
    %c0_i32_0 = arith.constant 0 : i32
    %c0_i32_1 = arith.constant 0 : i32
    return %c0_i32, %c0_i32_0 : i32, i32
  }
  func.func @transform_7(%arg0: i32) -> (i32, i32) {
    %c0_i32 = arith.constant 0 : i32
    %c0_i32_0 = arith.constant 0 : i32
    return %arg0, %c0_i32 : i32, i32
  }
}

</mosaic_0001>

<bundles_post_ra>
// kernel: tpu_custom_call.1
= control target key start
LH: loop header
LB: loop body
LE: loop exit
PB: predicated region body
PF: predicated region fallthrough
CT: control target
= control target key end

     0   :  { %6 = vsyncpa [#allocation3], 0  ;;  %s453_s0 = inlined_call_operand.hbm [shape: f32[8,128], index: 0, kind: input, shape index: {}]   ;;  %s454_s1 = inlined_call_operand.hbm [shape: f32[16,128], index: 1, kind: output, shape index: {}]  }
   0x1   :  { %7 = vsyncpa [#allocation4], 0 }
   0x2   :  { %9 = vsyncpa [#allocation4 + $0x1], 0  ;;  %s347_s6 = smov 0   ;;  %s349_s7 = smov 0  }
   0x3   :  { %s351_s8 = smov 0   ;;  %s353_s9 = smov 0  }
   0x4 LB: > { %s368_s10 = sadd.s32 4294967295, %s333_s9   ;;  %s183_s11 = sadd.s32 4294967294, %s333_s9   ;;  %s333_s9 = sphi %s353_s9, %s462_s9   ;;  %s329_s8 = sphi %s351_s8, %s461_s8   ;;  %s325_s7 = sphi %s349_s7, %s460_s7   ;;  %s321_s6 = sphi %s347_s6, %s459_s6  }
   0x5   : > { %s372_s12 = sadd.s32 1, %s333_s9   ;;  %s43_s13 = sadd.s32 1, %s329_s8 }
   0x6   : > { %s40_s14 = ssub.s32 %s333_s9, %s372_s12  ;;  %p53_p0 = scmp.ne.s32.totalorder %s329_s8, %s325_s7 }
   0x7   : > { %p41_p1 = scmp.eq.s32.totalorder %s40_s14, 0  ;;  %p54_p2 = scmp.eq.s32.totalorder %s368_s10, 1 }
   0x8   : > { %p59_p3 = scmp.ne.s32.totalorder %s325_s7, %s321_s6  ;;  %p60_p4 = scmp.eq.s32.totalorder %s183_s11, 1 }
   0x9   : > { %s383_s15 = scalar_select %p41_p1, %s329_s8, %s43_s13  }
   0xa   : > { %p385_p5 = por %p54_p2, %p53_p0  ;;  %p389_p6 = por %p60_p4, %p59_p3 }
   0xb   : > { %p184_p7 = scmp.ge.s32.totalorder %s333_s9, 1  ;;  %p67_p8 = scmp.lt.s32.totalorder %s333_s9, 3 }
   0xc   : > { %s456_s17 = scalar_select %p389_p6, 1, 0 }
   0xd   : > { %p207_p9 = scmp.eq.s32.totalorder %s368_s10, 0  ;;  %p396_p10 = pnand %p184_p7, %p67_p8 }
   0xe   : > { %s335_s19 = smov [#allocation2]  }
   0xf   : > { %s80_s20 = sshll.u32 %s335_s19, 4  ;;  %p199_p11 = pneg %p396_p10  ;;  %s81_s20 = int_to_ptr.vmem [resolvable:$true] %s80_s20 }
  0x10   : > { %s254_s21 = scalar_lea.vmem %s81_s20, 128  ;;  %p262_p3 = scmp.lt.s32.totalorder %s81_s20, %s81_s20 }
  0x11   : > { %p200_p12 = pnand %p207_p9, %p199_p11  ;;  %p255_p0 = scmp.ne.s32.totalorder %s81_s20, %s254_s21 }
  0x12   : > { %p263_p4 = scmp.lt.s32.totalorder %s254_s21, %s254_s21 }
  0x13   : > { %p245_p13 = pneg %p200_p12 }
  0x14   : > { %p264_p6 = por %p263_p4, %p262_p3 }
  0x15   : > { %p257_p1 = pnand %p255_p0, %p245_p13 }
  0x17   : > { %p258_p2 = pneg %p257_p1 }
  0x19   : > { %p265_p7 = pnand %p264_p6, %p258_p2 }
  0x1b   : > { %268 = shalt.err (!%p265_p7)
}
  0x1c   : > { %202 = dma.hbm_to_vmem [thread:$0]  (!%p200_p12), %s453_s0, 128, %s81_s20, [#allocation3]  }
  0x1d   : > { %93 = sbr.rel (%p396_p10) target bundleno = 60 (0x3c), region = 24 }
  0x22   : > { %312 = dma.done.wait (%p207_p9), [#allocation3], 128  }
  0x23   : > { %314 = vsyncadd (%p207_p9), [#allocation3], 4294967168  ;;  %s105_s24 = sand.u32 1, %s325_s7   ;;  %s190_s28 = sshll.u32 %s368_s10, 7  ;;  %v108_v0 = vld [vmem:[#allocation2] sm:$0xff] }
  0x24   : > { %s188_s25 = sshll.u32 %s105_s24, 3  ;;  %s122_s2 = scalar_lea.hbm %s454_s1, %s190_s28 }
  0x25   : > { %s107_s26 = scalar_lea.vmem [#allocation5], %s188_s25  ;;  %s111_s3 = scalar_lea.sflag [#allocation4], %s105_s24 }
  0x26   : > { %s124_s27 = sshll.u32 %s107_s26, 4  ;;  %109 = vst [vmem:[%s107_s26] sm:$0xff] %v108_v0  ;;  %s336_s5 = smov [#allocation5]   ;;  %s415_s27 = int_to_ptr.vmem [resolvable:$true] %s124_s27 }
  0x27   : > { %s269_s4 = scalar_lea.vmem %s415_s27, 128  ;;  %s273_s11 = sshll.u32 %s336_s5, 4  ;;  %s274_s11 = int_to_ptr.vmem [resolvable:$false] %s273_s11 }
  0x28   : > { %p270_p6 = scmp.ne.s32.totalorder %s415_s27, %s269_s4  ;;  %s275_s10 = scalar_lea.vmem %s274_s11, 256 }
  0x29   : > { %p276_p10 = scmp.lt.s32.totalorder %s415_s27, %s274_s11  ;;  %p277_p11 = scmp.lt.s32.totalorder %s275_s10, %s269_s4 }
  0x2a   : > { %p271_p8 = pnand %p270_p6, %p385_p5 }
  0x2b   : > { %p278_p12 = por %p277_p11, %p276_p10 }
  0x2c   : > { %p272_p9 = pneg %p271_p8 }
  0x2e   : > { %p279_p13 = pnand %p278_p12, %p272_p9 }
  0x30   : > { %282 = shalt.err (!%p279_p13)
}
  0x31   : > { %s283_s13 = scalar_lea.hbm %s122_s2, 128  ;;  %s287_s19 = scalar_lea.hbm %s454_s1, 256 }
  0x32   : > { %p284_p0 = scmp.ne.s32.totalorder %s122_s2, %s283_s13  ;;  %p288_p3 = scmp.lt.s32.totalorder %s122_s2, %s454_s1 }
  0x33   : > { %p289_p4 = scmp.lt.s32.totalorder %s287_s19, %s283_s13 }
  0x34   : > { %p285_p1 = pnand %p284_p0, %p385_p5 }
  0x35   : > { %p290_p7 = por %p289_p4, %p288_p3 }
  0x36   : > { %p286_p2 = pneg %p285_p1 }
  0x38   : > { %p291_p6 = pnand %p290_p7, %p286_p2 }
  0x3a   : > { %294 = shalt.err (!%p291_p6)
}
  0x3b   : > { %197 = dma.vmem_to_hbm [thread:$0]  (%p385_p5), %s415_s27, 128, %s122_s2, %s111_s3  }
  0x3c PF: > { %p209_p8 = scmp.ge.s32.totalorder %s333_s9, 2  ;;  %s136_s22 = sand.u32 1, %s321_s6  }
  0x3d   : > { %p458_p9 = scmp.ne.s32.totalorder %s456_s17, 0  ;;  %s137_s23 = scalar_lea.sflag [#allocation4], %s136_s22 }
  0x3f   : > { %p204_p10 = pnand %p209_p8, %p458_p9 }
  0x41   : > { %p205_p11 = pneg %p204_p10 }
  0x43   : > { %316 = dma.done.wait (%p205_p11), %s137_s23, 128  }
  0x44   : > { %318 = vsyncadd (%p205_p11), %s137_s23, 4294967168  ;;  %p12_p12 = scmp.ge.s32.totalorder %s372_s12, 4   ;;  %s459_s6 = smov %s325_s7 }
  0x45   : > { %s460_s7 = smov %s329_s8  ;;  %s461_s8 = smov %s383_s15 }
  0x46   : > { %s462_s9 = smov %s372_s12  ;;  %14 = sbr.rel (!%p12_p12) target bundleno = 4 (0x4), region = 61 }
  0x4b   :  { %142 = vsyncpa [#allocation3], 1 }
  0x4c   :  { %144 = vsyncpa [#allocation3 + $0x1], 1 }
  0x4d   :  { %145 = vsyncpa [#allocation4], 1 }
  0x4e   :  { %147 = vsyncpa [#allocation4 + $0x1], 1 }

// kernel: feed_forward.1
= control target key start
LH: loop header
LB: loop body
LE: loop exit
PB: predicated region body
PF: predicated region fallthrough
CT: control target
= control target key end

     0   :  { %12 = vsyncpa [#allocation3], 0  ;;  %s1439_s24 = smov 0   ;;  %s1769_s0 = inlined_call_operand.vmem [shape: bf16[128,128], index: 0, kind: input, shape index: {}]   ;;  %s1770_s1 = inlined_call_operand.vmem [shape: f32[1,128], index: 1, kind: input, shape index: {}]   ;;  %s1771_s2 = inlined_call_operand.vmem [shape: f32[1,128], index: 2, kind: input, shape index: {}]   ;;  %s1772_s3 = inlined_call_operand.vmem [shape: bf16[128,256], index: 3, kind: input, shape index: {}]   ;;  %s1773_s4 = inlined_call_operand.vmem [shape: f32[1,256], index: 4, kind: input, shape index: {}]   ;;  %s1774_s5 = inlined_call_operand.hbm [shape: bf16[256,128], index: 5, kind: input, shape index: {}]   ;;  %s1775_s6 = inlined_call_operand.vmem [shape: f32[1,128], index: 6, kind: input, shape index: {}]   ;;  %s1776_s7 = inlined_call_operand.vmem [shape: bf16[128,128], index: 7, kind: output, shape index: {}]  }
   0x1 LB: > { %s1101_s25 = sadd.s32 4294967295, %s1393_s24   ;;  %p1103_p0 = scmp.ge.s32.totalorder %s1393_s24, 1  ;;  %s1393_s24 = sphi %s1439_s24, %s18_s24  }
   0x2   : > { %p201_p1 = scmp.lt.s32.totalorder %s1393_s24, 3  ;;  %s1395_s26 = smov [#allocation2]  }
   0x3   : > { %s225_s27 = sshll.u32 %s1395_s26, 4  ;;  %p1451_p3 = scmp.eq.s32.totalorder %s1101_s25, 0  ;;  %s226_s27 = int_to_ptr.vmem [resolvable:$true] %s225_s27 }
   0x4   : > { %p1447_p2 = pnand %p1103_p0, %p201_p1  ;;  %s1368_s30 = scalar_lea.vmem %s226_s27, 2048 }
   0x5   : > { %p1369_p7 = scmp.ne.s32.totalorder %s226_s27, %s1368_s30  ;;  %p1376_p10 = scmp.lt.s32.totalorder %s226_s27, %s226_s27 }
   0x6   : > { %p1251_p4 = pneg %p1447_p2  ;;  %p1377_p11 = scmp.lt.s32.totalorder %s1368_s30, %s1368_s30 }
   0x8   : > { %p1252_p5 = pnand %p1451_p3, %p1251_p4  ;;  %p1378_p12 = por %p1377_p11, %p1376_p10 }
   0xa   : > { %p1359_p6 = pneg %p1252_p5 }
   0xc   : > { %p1371_p8 = pnand %p1369_p7, %p1359_p6 }
   0xe   : > { %p1372_p9 = pneg %p1371_p8 }
  0x10   : > { %p1379_p13 = pnand %p1378_p12, %p1372_p9 }
  0x12   : > { %1382 = shalt.err (!%p1379_p13)
}
  0x13   : > { %s1396_s8 = smov 64   ;;  %s1397_s9 = smov 4  }
  0x14   : > { %1254 = dma.hbm_to_vmem [thread:$0]  (!%p1252_p5), %s1774_s5, 2048, %s226_s27, [#allocation3], %s1396_s8, %s1396_s8, %s1397_s9  }
  0x15   : > { %253 = sbr.rel (%p1447_p2) target bundleno = 675 (0x2a3), region = 48 }
  0x1a   : > { %1388 = dma.done.wait (%p1451_p3), [#allocation3], 2048  }
  0x1b   : > { %1390 = vsyncadd (%p1451_p3), [#allocation3], 4294965248  ;;  %s1108_s12 = sshll.u32 %s1101_s25, 3  ;;  %v1269_v12 = vld [vmem:[%s1772_s3 + $0x74] ss:$8 sps:$4 sm:$0xff]   ;;  %v1398_v36 = vmov 0  }
  0x1c   : > { %p286_p0 = scmp.lt.s32.totalorder %s1108_s12, 15  ;;  %v1271_v13 = vld [vmem:[%s1772_s3 + $0x70] ss:$8 sps:$4 sm:$0xff]   ;;  %568 = vmatprep.subr.bf16.mxu0 %v1269_v12  ;;  %v1272_v16 = vld [vmem:[%s1772_s3 + $0x64] ss:$8 sps:$4 sm:$0xff]   ;;  %600 = vmatprep.mubr.bf16.mxu0 %v1398_v36 }
  0x1d   : > { %569 = vmatpush1.bf16.msra.mxu0 %v1271_v13  ;;  %v1274_v18 = vld [vmem:[%s1772_s3 + $0x60] ss:$8 sps:$4 sm:$0xff]   ;;  %v1275_v21 = vld [vmem:[%s1772_s3 + $0x54] ss:$8 sps:$4 sm:$0xff]   ;;  %v1277_v23 = vld [vmem:[%s1772_s3 + $0x50] ss:$8 sps:$4 sm:$0xff]  }
  0x1e   : > { %s1780_s12 = smov (!%p286_p0, %s1108_s12), 15  ;;  %570 = vmatprep.subr.bf16.mxu0 %v1272_v16  ;;  %v1278_v25 = vld [vmem:[%s1772_s3 + $0x44] ss:$8 sps:$4 sm:$0xff]   ;;  %v1280_v27 = vld [vmem:[%s1772_s3 + $0x40] ss:$8 sps:$4 sm:$0xff]  }
  0x1f   : > { %s1109_s13 = sshll.u32 %s1780_s12, 2  ;;  %v1281_v28 = vld [vmem:[%s1772_s3 + $0x34] ss:$8 sps:$4 sm:$0xff]   ;;  %v1283_v29 = vld [vmem:[%s1772_s3 + $0x30] ss:$8 sps:$4 sm:$0xff]  }
  0x20   : > { %s289_s16 = scalar_lea.vmem %s1769_s0, %s1109_s13  ;;  %v1284_v30 = vld [vmem:[%s1772_s3 + $0x24] ss:$8 sps:$4 sm:$0xff]   ;;  %v1286_v31 = vld [vmem:[%s1772_s3 + $0x20] ss:$8 sps:$4 sm:$0xff]   ;;  %v1287_v32 = vld [vmem:[%s1772_s3 + $0x14] ss:$8 sps:$4 sm:$0xff]   ;;  %s1760_s19 = scalar_lea.vmem %s1776_s7, %s1109_s13 }
  0x21   : > { %v1166_v0 = vld [vmem:[%s289_s16] sm:$0xff]   ;;  %v1201_v3 = vld [vmem:[%s289_s16 + $0x8] sm:$0xff]   ;;  %v1202_v8 = vld [vmem:[%s289_s16 + $0x10] sm:$0xff]   ;;  %571 = vmatpush1.bf16.msra.mxu0 %v1274_v18 }
  0x22   : > { %v1476_v1 = vunpack.c.l.bf16 %v1166_v0  ;;  %v1478_v2 = vunpack.c.h.bf16 %v1166_v0  ;;  %v1486_v6 = vunpack.c.l.bf16 %v1201_v3  ;;  %v1488_v7 = vunpack.c.h.bf16 %v1201_v3  ;;  %v1203_v17 = vld [vmem:[%s289_s16 + $0x18] sm:$0xff]   ;;  %572 = vmatprep.subr.bf16.mxu0 %v1275_v21  ;;  %v1290_v34 = vld [vmem:[%s1772_s3 + $0x4] ss:$8 sps:$4 sm:$0xff]   ;;  %v1292_v35 = vld [vmem:[%s1772_s3] ss:$8 sps:$4 sm:$0xff]  }
  0x23   : > { %v1496_v11 = vunpack.c.l.bf16 %v1202_v8  ;;  %v1504_v14 = vunpack.c.h.bf16 %v1202_v8  ;;  %v1518_v20 = vunpack.c.l.bf16 %v1203_v17  ;;  %v1523_v22 = vunpack.c.h.bf16 %v1203_v17  ;;  %v1289_v33 = vld [vmem:[%s1772_s3 + $0x10] ss:$8 sps:$4 sm:$0xff]  }
  0x24   : > { %314 = vadd.xlane.f32.xlu0 %v1476_v1  ;;  %v330_v4 = vmul.f32 %v1476_v1, %v1476_v1  ;;  %v331_v5 = vmul.f32 %v1478_v2, %v1478_v2  ;;  %v332_v9 = vmul.f32 %v1486_v6, %v1486_v6  ;;  %v333_v10 = vmul.f32 %v1488_v7, %v1488_v7 }
  0x25   : > { %v334_v15 = vmul.f32 %v1496_v11, %v1496_v11  ;;  %v335_v19 = vmul.f32 %v1504_v14, %v1504_v14  ;;  %v336_v24 = vmul.f32 %v1518_v20, %v1518_v20  ;;  %573 = vmatpush1.bf16.msra.mxu0 %v1277_v23  ;;  %v337_v26 = vmul.f32 %v1523_v22, %v1523_v22 }
  0x26   : > { %338 = vadd.xlane.f32.xlu1 %v330_v4  ;;  %574 = vmatprep.subr.bf16.mxu0 %v1278_v25 }
  0x28   : > { %316 = vadd.xlane.f32.xlu0 %v1478_v2 }
  0x29   : > { %575 = vmatpush1.bf16.msra.mxu0 %v1280_v27 }
  0x2a   : > { %340 = vadd.xlane.f32.xlu1 %v331_v5  ;;  %576 = vmatprep.subr.bf16.mxu0 %v1281_v28 }
  0x2c   : > { %318 = vadd.xlane.f32.xlu0 %v1486_v6 }
  0x2d   : > { %577 = vmatpush1.bf16.msra.mxu0 %v1283_v29 }
  0x2e   : > { %320 = vadd.xlane.f32.xlu1 %v1488_v7  ;;  %578 = vmatprep.subr.bf16.mxu0 %v1284_v30 }
  0x30   : > { %342 = vadd.xlane.f32.xlu0 %v332_v9 }
  0x31   : > { %579 = vmatpush1.bf16.msra.mxu0 %v1286_v31  ;;  %v1587_v31 = vld [vmem:[%s1770_s1] ss:$0 sm:$0xff] }
  0x32   : > { %344 = vadd.xlane.f32.xlu1 %v333_v10  ;;  %580 = vmatprep.subr.bf16.mxu0 %v1287_v32 }
  0x34   : > { %322 = vadd.xlane.f32.xlu0 %v1496_v11 }
  0x35   : > { %581 = vmatpush1.bf16.msra.mxu0 %v1289_v33 }
  0x36   : > { %324 = vadd.xlane.f32.xlu1 %v1504_v14  ;;  %582 = vmatprep.subr.bf16.mxu0 %v1290_v34 }
  0x38   : > { %346 = vadd.xlane.f32.xlu0 %v334_v15 }
  0x39   : > { %583 = vmatpush1.bf16.msra.mxu0 %v1292_v35 }
  0x3a   : > { %348 = vadd.xlane.f32.xlu1 %v335_v19 }
  0x3c   : > { %326 = vadd.xlane.f32.xlu0 %v1518_v20 }
  0x3e   : > { %328 = vadd.xlane.f32.xlu1 %v1523_v22 }
  0x40   : > { %350 = vadd.xlane.f32.xlu0 %v336_v24 }
  0x42   : > { %352 = vadd.xlane.f32.xlu1 %v337_v26 }
  0xad   : > { %v315_v37 = vpop.xlane.xlu0 %314 }
  0xae   : > { %v354_v38 = vmul.f32 0.0078125, %v315_v37 }
  0xaf   : > { %v339_v39 = vpop.xlane.xlu1 %338 }
  0xb0   : > { %v370_v40 = vmul.f32 %v354_v38, %v354_v38  ;;  %v362_v41 = vmul.f32 0.0078125, %v339_v39  ;;  %v410_v18 = vsub.f32 %v1476_v1, %v354_v38 }
  0xb1   : > { %v317_v42 = vpop.xlane.xlu0 %316 }
  0xb2   : > { %v378_v43 = vsub.f32 %v362_v41, %v370_v40  ;;  %v355_v44 = vmul.f32 0.0078125, %v317_v42 }
  0xb3   : > { %v341_v45 = vpop.xlane.xlu1 %340 }
  0xb4   : > { %v386_v46 = vmax.f32 %v378_v43, 0.0  ;;  %v371_v47 = vmul.f32 %v355_v44, %v355_v44  ;;  %v363_v48 = vmul.f32 0.0078125, %v341_v45  ;;  %v411_v32 = vsub.f32 %v1478_v2, %v355_v44  ;;  %v1113_v2 = vld [vmem:[%s1771_s2] ss:$0 sm:$0xff] }
  0xb5   : > { %v319_v49 = vpop.xlane.xlu0 %318 }
  0xb6   : > { %v394_v50 = vadd.f32 1e-05, %v386_v46  ;;  %v379_v51 = vsub.f32 %v363_v48, %v371_v47  ;;  %v1565_v52 = vmul.f32 0.0078125, %v319_v49 }
  0xb7   : > { %v321_v53 = vpop.xlane.xlu1 %320 }
  0xb8   : > { %1309 = vrsqrt.f32 %v394_v50  ;;  %v387_v54 = vmax.f32 %v379_v51, 0.0  ;;  %v372_v55 = vmul.f32 %v1565_v52, %v1565_v52  ;;  %v1569_v56 = vmul.f32 0.0078125, %v321_v53 }
  0xb9   : > { %v343_v57 = vpop.xlane.xlu0 %342  ;;  %v412_v49 = vsub.f32 %v1486_v6, %v1565_v52 }
  0xba   : > { %v395_v58 = vadd.f32 1e-05, %v387_v54  ;;  %v364_v59 = vmul.f32 0.0078125, %v343_v57  ;;  %v373_v61 = vmul.f32 %v1569_v56, %v1569_v56  ;;  %v413_v57 = vsub.f32 %v1488_v7, %v1569_v56 }
  0xbb   : > { %v345_v60 = vpop.xlane.xlu1 %344 }
  0xbc   : > { %1311 = vrsqrt.f32 %v395_v58  ;;  %v380_v62 = vsub.f32 %v364_v59, %v372_v55  ;;  %v365_v63 = vmul.f32 0.0078125, %v345_v60 }
  0xbd   : > { %v323_v0 = vpop.xlane.xlu0 %322 }
  0xbe   : > { %v388_v3 = vmax.f32 %v380_v62, 0.0  ;;  %v381_v4 = vsub.f32 %v365_v63, %v373_v61  ;;  %v1573_v5 = vmul.f32 0.0078125, %v323_v0 }
  0xbf   : > { %v325_v8 = vpop.xlane.xlu1 %324 }
  0xc0   : > { %v396_v9 = vadd.f32 1e-05, %v388_v3  ;;  %v389_v10 = vmax.f32 %v381_v4, 0.0  ;;  %v374_v12 = vmul.f32 %v1573_v5, %v1573_v5  ;;  %v1577_v13 = vmul.f32 0.0078125, %v325_v8 }
  0xc1   : > { %v347_v15 = vpop.xlane.xlu0 %346  ;;  %v414_v52 = vsub.f32 %v1496_v11, %v1573_v5 }
  0xc2   : > { %1313 = vrsqrt.f32 %v396_v9  ;;  %v397_v16 = vadd.f32 1e-05, %v389_v10  ;;  %v366_v17 = vmul.f32 0.0078125, %v347_v15  ;;  %v375_v21 = vmul.f32 %v1577_v13, %v1577_v13 }
  0xc3   : > { %v349_v19 = vpop.xlane.xlu1 %348  ;;  %v415_v8 = vsub.f32 %v1504_v14, %v1577_v13 }
  0xc4   : > { %1315 = vrsqrt.f32 %v397_v16  ;;  %v382_v23 = vsub.f32 %v366_v17, %v374_v12  ;;  %v367_v24 = vmul.f32 0.0078125, %v349_v19 }
  0xc5   : > { %v1310_v25 = vpop.eup %1309  ;;  %v327_v26 = vpop.xlane.xlu0 %326 }
  0xc6   : > { %v390_v27 = vmax.f32 %v382_v23, 0.0  ;;  %v383_v28 = vsub.f32 %v367_v24, %v375_v21  ;;  %v1582_v29 = vmul.f32 0.0078125, %v327_v26  ;;  %v418_v30 = vmul.f32 %v1310_v25, %v410_v18 }
  0xc7   : > { %v329_v1 = vpop.xlane.xlu1 %328 }
  0xc8   : > { %v398_v33 = vadd.f32 1e-05, %v390_v27  ;;  %v391_v34 = vmax.f32 %v383_v28, 0.0  ;;  %v376_v35 = vmul.f32 %v1582_v29, %v1582_v29  ;;  %v361_v38 = vmul.f32 0.0078125, %v329_v1  ;;  %v1296_v1 = vld [vmem:[#allocation2 + $0x30] sm:$0xff]  }
  0xc9   : > { %v1312_v37 = vpop.eup %1311  ;;  %v351_v39 = vpop.xlane.xlu0 %350  ;;  %v433_v40 = vmul.f32 %v1587_v31, %v418_v30  ;;  %v416_v11 = vsub.f32 %v1518_v20, %v1582_v29  ;;  %v1293_v20 = vld [vmem:[#allocation2 + $0x78] sm:$0xff]  }
  0xca   : > { %1317 = vrsqrt.f32 %v398_v33  ;;  %v399_v41 = vadd.f32 1e-05, %v391_v34  ;;  %v368_v42 = vmul.f32 0.0078125, %v351_v39  ;;  %v419_v43 = vmul.f32 %v1312_v37, %v411_v32  ;;  %v1294_v29 = vld [vmem:[#allocation2 + $0x38] sm:$0xff]   ;;  %1207 = vmatprep.subr.bf16.mxu1 %v1293_v20  ;;  %v1297_v32 = vld [vmem:[#allocation2 + $0x68] sm:$0xff]   ;;  %v1299_v34 = vld [vmem:[#allocation2 + $0x60] sm:$0xff]  }
  0xcb   : > { %v377_v45 = vmul.f32 %v361_v38, %v361_v38  ;;  %v353_v46 = vpop.xlane.xlu1 %352  ;;  %v448_v53 = vadd.f32 %v1113_v2, %v433_v40  ;;  %v417_v21 = vsub.f32 %v1523_v22, %v361_v38  ;;  %1208 = vmatpush3.bf16.msra.mxu1 %v1294_v29  ;;  %v1295_v22 = vld [vmem:[#allocation2 + $0x70] sm:$0xff]   ;;  %v1298_v33 = vld [vmem:[#allocation2 + $0x28] sm:$0xff]  }
  0xcc   : > { %1319 = vrsqrt.f32 %v399_v41  ;;  %v384_v44 = vsub.f32 %v368_v42, %v376_v35  ;;  %v369_v47 = vmul.f32 0.0078125, %v353_v46  ;;  %v434_v48 = vmul.f32 %v1587_v31, %v419_v43  ;;  %1209 = vmatprep.subr.bf16.mxu1 %v1295_v22  ;;  %v1302_v35 = vld [vmem:[#allocation2 + $0x18] sm:$0xff]   ;;  %v1303_v37 = vld [vmem:[#allocation2 + $0x50] sm:$0xff]   ;;  %v1305_v39 = vld [vmem:[#allocation2 + $0x48] sm:$0xff]  }
  0xcd   : > { %v1304_v38 = vld [vmem:[#allocation2 + $0x10] sm:$0xff]   ;;  %v1306_v40 = vld [vmem:[#allocation2 + $0x8] sm:$0xff]   ;;  %v1307_v41 = vld [vmem:[#allocation2 + $0x40] sm:$0xff]   ;;  %v478_v43 = vlaneseq }
  0xce   : > { %v392_v50 = vmax.f32 %v384_v44, 0.0  ;;  %v385_v51 = vsub.f32 %v369_v47, %v377_v45  ;;  %v449_v54 = vadd.f32 %v1113_v2, %v434_v48  ;;  %v1308_v42 = vld [vmem:[#allocation2] sm:$0xff]  }
  0xcf   : > { %v1314_v55 = vpop.eup %1313  ;;  %1210 = vmatpush3.bf16.msra.mxu1 %v1296_v1  ;;  %v479_v45 = vshrl.u32 %v478_v43, 7 }
  0xd0   : > { %v400_v58 = vadd.f32 1e-05, %v392_v50  ;;  %v393_v59 = vmax.f32 %v385_v51, 0.0  ;;  %v456_v60 = vpack.c.bf16 %v449_v54, %v448_v53  ;;  %v420_v61 = vmul.f32 %v1314_v55, %v412_v49  ;;  %1211 = vmatprep.subr.bf16.mxu1 %v1297_v32 }
  0xd1   : > { %v1316_v62 = vpop.eup %1315  ;;  %v480_v46 = vsub.s32 0, %v479_v45  ;;  %v484_v44 = vsub.s32 1, %v479_v45 }
  0xd2   : > { %1321 = vrsqrt.f32 %v400_v58  ;;  %v401_v63 = vadd.f32 1e-05, %v393_v59  ;;  %601 = vmatmul.mubr.bf16.vlgmr.msra.gmra.mxu0 %v456_v60  ;;  %v421_v0 = vmul.f32 %v1316_v62, %v413_v57  ;;  %v435_v3 = vmul.f32 %v1587_v31, %v420_v61 }
  0xd3   : > { %610 = vmatprep.mubr.bf16.mxu0 %v1398_v36  ;;  %1212 = vmatpush3.bf16.msra.mxu1 %v1298_v33 }
  0xd4   : > { %1323 = vrsqrt.f32 %v401_v63  ;;  %v436_v6 = vmul.f32 %v1587_v31, %v421_v0  ;;  %v450_v7 = vadd.f32 %v1113_v2, %v435_v3  ;;  %1213 = vmatprep.subr.bf16.mxu1 %v1299_v34 }
  0xd6   : > { %v451_v56 = vadd.f32 %v1113_v2, %v436_v6 }
  0xd7   : > { %v1318_v4 = vpop.eup %1317 }
  0xd8   : > { %v457_v9 = vpack.c.bf16 %v451_v56, %v450_v7  ;;  %v422_v10 = vmul.f32 %v1318_v4, %v414_v52 }
  0xd9   : > { %v1320_v12 = vpop.eup %1319 }
  0xda   : > { %611 = vmatmul.mubr.bf16.gmra.mxu0 %v457_v9  ;;  %v423_v15 = vmul.f32 %v1320_v12, %v415_v8  ;;  %v437_v16 = vmul.f32 %v1587_v31, %v422_v10 }
  0xdb   : > { %620 = vmatprep.mubr.bf16.mxu0 %v1398_v36 }
  0xdc   : > { %v438_v17 = vmul.f32 %v1587_v31, %v423_v15  ;;  %v452_v5 = vadd.f32 %v1113_v2, %v437_v16 }
  0xde   : > { %v453_v18 = vadd.f32 %v1113_v2, %v438_v17 }
  0xdf   : > { %v1322_v19 = vpop.eup %1321 }
  0xe0   : > { %v458_v14 = vpack.c.bf16 %v453_v18, %v452_v5  ;;  %v424_v13 = vmul.f32 %v1322_v19, %v416_v11 }
  0xe1   : > { %v1324_v23 = vpop.eup %1323 }
  0xe2   : > { %621 = vmatmul.mubr.bf16.gmra.mxu0 %v458_v14  ;;  %v425_v24 = vmul.f32 %v1324_v23, %v417_v21  ;;  %v439_v25 = vmul.f32 %v1587_v31, %v424_v13 }
  0xe3   : > { %630 = vmatprep.mubr.bf16.mxu0 %v1398_v36  ;;  %v1300_v36 = vld [vmem:[#allocation2 + $0x20] sm:$0xff]  }
  0xe4   : > { %v440_v26 = vmul.f32 %v1587_v31, %v425_v24  ;;  %v454_v27 = vadd.f32 %v1113_v2, %v439_v25  ;;  %1214 = vmatpush3.bf16.msra.mxu1 %v1300_v36  ;;  %v1301_v31 = vld [vmem:[#allocation2 + $0x58] sm:$0xff]  }
  0xe5   : > { %1215 = vmatprep.subr.bf16.mxu1 %v1301_v31 }
  0xe6   : > { %v455_v28 = vadd.f32 %v1113_v2, %v440_v26  ;;  %v476_v2 = vld [vmem:[%s1773_s4] sm:$0x3] }
  0xe7   : > { %v1620_v47 = vrot.slane %v476_v2, %v480_v46  ;;  %v1622_v48 = vrot.slane %v476_v2, %v484_v44 }
  0xe8   : > { %v459_v30 = vpack.c.bf16 %v455_v28, %v454_v27  ;;  %1216 = vmatpush3.bf16.msra.mxu1 %v1302_v35 }
  0xe9   : > { %1217 = vmatprep.subr.bf16.mxu1 %v1303_v37 }
  0xea   : > { %631 = vmatmul.mubr.bf16.gmra.mxu0 %v459_v30 }
  0xec   : > { %1218 = vmatpush3.bf16.msra.mxu1 %v1304_v38 }
  0xed   : > { %1219 = vmatprep.subr.bf16.mxu1 %v1305_v39 }
  0xf0   : > { %1220 = vmatpush3.bf16.msra.mxu1 %v1306_v40 }
  0xf1   : > { %1221 = vmatprep.subr.bf16.mxu1 %v1307_v41 }
  0xf4   : > { %1222 = vmatpush3.bf16.msra.mxu1 %v1308_v42 }
 0x192   : > { %v602_v49 = vpop.f32.mrf.mxu0 }
 0x193   : > { %v1625_v50 = vadd.f32 %v602_v49, %v1620_v47 }
 0x194   : > { %v604_v51 = vpop.f32.mrf.mxu0 }
 0x195   : > { %v641_v53 = vmul.f32 %v1625_v50, %v1625_v50  ;;  %v1630_v54 = vadd.f32 %v604_v51, %v1622_v48 }
 0x196   : > { %v606_v55 = vpop.f32.mrf.mxu0 }
 0x197   : > { %v657_v57 = vmul.f32 %v641_v53, %v1625_v50  ;;  %v642_v58 = vmul.f32 %v1630_v54, %v1630_v54  ;;  %v1636_v59 = vadd.f32 %v606_v55, %v1620_v47 }
 0x198   : > { %v608_v60 = vpop.f32.mrf.mxu0 }
 0x199   : > { %v673_v61 = vmul.f32 0.044715, %v657_v57  ;;  %v658_v62 = vmul.f32 %v642_v58, %v1630_v54  ;;  %v643_v63 = vmul.f32 %v1636_v59, %v1636_v59  ;;  %v1642_v0 = vadd.f32 %v608_v60, %v1622_v48 }
 0x19a   : > { %v612_v3 = vpop.f32.mrf.mxu0 }
 0x19b   : > { %v689_v6 = vadd.f32 %v673_v61, %v1625_v50  ;;  %v674_v52 = vmul.f32 0.044715, %v658_v62  ;;  %v659_v7 = vmul.f32 %v643_v63, %v1636_v59  ;;  %v644_v56 = vmul.f32 %v1642_v0, %v1642_v0 }
 0x19c   : > { %v1649_v4 = vadd.f32 %v612_v3, %v1620_v47  ;;  %v614_v8 = vpop.f32.mrf.mxu0 }
 0x19d   : > { %v705_v9 = vmul.f32 0.7978846, %v689_v6  ;;  %v690_v10 = vadd.f32 %v674_v52, %v1630_v54  ;;  %v675_v12 = vmul.f32 0.044715, %v659_v7  ;;  %v660_v15 = vmul.f32 %v644_v56, %v1642_v0 }
 0x19e   : > { %v645_v16 = vmul.f32 %v1649_v4, %v1649_v4  ;;  %v1656_v17 = vadd.f32 %v614_v8, %v1622_v48  ;;  %v616_v11 = vpop.f32.mrf.mxu0 }
 0x19f   : > { %1325 = vtanh.f32 %v705_v9  ;;  %v691_v5 = vadd.f32 %v675_v12, %v1636_v59  ;;  %v676_v18 = vmul.f32 0.044715, %v660_v15  ;;  %v1660_v19 = vadd.f32 %v616_v11, %v1620_v47 }
 0x1a0   : > { %v661_v21 = vmul.f32 %v645_v16, %v1649_v4  ;;  %v646_v14 = vmul.f32 %v1656_v17, %v1656_v17  ;;  %v618_v13 = vpop.f32.mrf.mxu0  ;;  %v706_v23 = vmul.f32 0.7978846, %v690_v10 }
 0x1a1   : > { %v707_v24 = vmul.f32 0.7978846, %v691_v5  ;;  %v692_v25 = vadd.f32 %v676_v18, %v1642_v0  ;;  %v647_v26 = vmul.f32 %v1660_v19, %v1660_v19  ;;  %v1669_v27 = vadd.f32 %v618_v13, %v1622_v48 }
 0x1a2   : > { %v677_v28 = vmul.f32 0.044715, %v661_v21  ;;  %v662_v30 = vmul.f32 %v646_v14, %v1656_v17  ;;  %v622_v20 = vpop.f32.mrf.mxu0  ;;  %1327 = vtanh.f32 %v706_v23 }
 0x1a3   : > { %1329 = vtanh.f32 %v707_v24  ;;  %v663_v29 = vmul.f32 %v647_v26, %v1660_v19  ;;  %v648_v22 = vmul.f32 %v1669_v27, %v1669_v27  ;;  %v1676_v1 = vadd.f32 %v622_v20, %v1620_v47 }
 0x1a4   : > { %v693_v32 = vadd.f32 %v677_v28, %v1649_v4  ;;  %v678_v33 = vmul.f32 0.044715, %v662_v30  ;;  %v624_v34 = vpop.f32.mrf.mxu0  ;;  %v708_v36 = vmul.f32 0.7978846, %v692_v25 }
 0x1a5   : > { %v679_v31 = vmul.f32 0.044715, %v663_v29  ;;  %v664_v35 = vmul.f32 %v648_v22, %v1669_v27  ;;  %v649_v37 = vmul.f32 %v1676_v1, %v1676_v1  ;;  %v1683_v38 = vadd.f32 %v624_v34, %v1622_v48 }
 0x1a6   : > { %v709_v39 = vmul.f32 0.7978846, %v693_v32  ;;  %v694_v40 = vadd.f32 %v678_v33, %v1656_v17  ;;  %v626_v41 = vpop.f32.mrf.mxu0  ;;  %1331 = vtanh.f32 %v708_v36 }
 0x1a7   : > { %v695_v42 = vadd.f32 %v679_v31, %v1660_v19  ;;  %v680_v43 = vmul.f32 0.044715, %v664_v35  ;;  %v665_v45 = vmul.f32 %v649_v37, %v1676_v1  ;;  %v650_v46 = vmul.f32 %v1683_v38, %v1683_v38 }
 0x1a8   : > { %1333 = vtanh.f32 %v709_v39  ;;  %v710_v2 = vmul.f32 0.7978846, %v694_v40  ;;  %v1691_v44 = vadd.f32 %v626_v41, %v1620_v47  ;;  %v628_v49 = vpop.f32.mrf.mxu0 }
 0x1a9   : > { %v711_v51 = vmul.f32 0.7978846, %v695_v42  ;;  %v696_v53 = vadd.f32 %v680_v43, %v1669_v27  ;;  %v681_v55 = vmul.f32 0.044715, %v665_v45  ;;  %v666_v57 = vmul.f32 %v650_v46, %v1683_v38 }
 0x1aa   : > { %1335 = vtanh.f32 %v710_v2  ;;  %v651_v58 = vmul.f32 %v1691_v44, %v1691_v44  ;;  %v1698_v60 = vadd.f32 %v628_v49, %v1622_v48  ;;  %v632_v61 = vpop.f32.mrf.mxu0 }
 0x1ab   : > { %1337 = vtanh.f32 %v711_v51  ;;  %v712_v62 = vmul.f32 0.7978846, %v696_v53  ;;  %v697_v63 = vadd.f32 %v681_v55, %v1676_v1  ;;  %v682_v3 = vmul.f32 0.044715, %v666_v57 }
 0x1ac   : > { %v1326_v6 = vpop.eup %1325  ;;  %v667_v52 = vmul.f32 %v651_v58, %v1691_v44  ;;  %v652_v7 = vmul.f32 %v1698_v60, %v1698_v60  ;;  %v1705_v56 = vadd.f32 %v632_v61, %v1620_v47  ;;  %v634_v8 = vpop.f32.mrf.mxu0 }
 0x1ad   : > { %1339 = vtanh.f32 %v712_v62  ;;  %v713_v9 = vmul.f32 0.7978846, %v697_v63  ;;  %v698_v10 = vadd.f32 %v682_v3, %v1683_v38  ;;  %v1709_v12 = vadd.f32 %v634_v8, %v1622_v48 }
 0x1ae   : > { %v683_v15 = vmul.f32 0.044715, %v667_v52  ;;  %v668_v16 = vmul.f32 %v652_v7, %v1698_v60  ;;  %v653_v11 = vmul.f32 %v1705_v56, %v1705_v56  ;;  %v636_v5 = vpop.f32.mrf.mxu0  ;;  %v737_v18 = vadd.f32 1.0, %v1326_v6 }
 0x1af   : > { %v1328_v21 = vpop.eup %1327  ;;  %1341 = vtanh.f32 %v713_v9  ;;  %v714_v14 = vmul.f32 0.7978846, %v698_v10  ;;  %v654_v13 = vmul.f32 %v1709_v12, %v1709_v12  ;;  %v1717_v23 = vadd.f32 %v636_v5, %v1620_v47 }
 0x1b0   : > { %v1330_v24 = vpop.eup %1329  ;;  %v699_v25 = vadd.f32 %v683_v15, %v1691_v44  ;;  %v684_v26 = vmul.f32 0.044715, %v668_v16  ;;  %v669_v28 = vmul.f32 %v653_v11, %v1705_v56  ;;  %v638_v30 = vpop.f32.mrf.mxu0  ;;  %v738_v20 = vadd.f32 1.0, %v1328_v21 }
 0x1b1   : > { %1343 = vtanh.f32 %v714_v14  ;;  %v670_v29 = vmul.f32 %v654_v13, %v1709_v12  ;;  %v655_v22 = vmul.f32 %v1717_v23, %v1717_v23  ;;  %v1725_v32 = vadd.f32 %v638_v30, %v1622_v48 }
 0x1b2   : > { %v715_v33 = vmul.f32 0.7978846, %v699_v25  ;;  %v700_v47 = vadd.f32 %v684_v26, %v1698_v60  ;;  %v685_v34 = vmul.f32 0.044715, %v669_v28  ;;  %v754_v36 = vmul.f32 0.5, %v738_v20 }
 0x1b3   : > { %v1332_v31 = vpop.eup %1331  ;;  %v686_v35 = vmul.f32 0.044715, %v670_v29  ;;  %v671_v37 = vmul.f32 %v655_v22, %v1717_v23  ;;  %v656_v39 = vmul.f32 %v1725_v32, %v1725_v32  ;;  %v739_v40 = vadd.f32 1.0, %v1330_v24 }
 0x1b4   : > { %1345 = vtanh.f32 %v715_v33  ;;  %v716_v41 = vmul.f32 0.7978846, %v700_v47  ;;  %v701_v42 = vadd.f32 %v685_v34, %v1705_v56  ;;  %v740_v43 = vadd.f32 1.0, %v1332_v31 }
 0x1b5   : > { %v1334_v48 = vpop.eup %1333  ;;  %v702_v45 = vadd.f32 %v686_v35, %v1709_v12  ;;  %v687_v46 = vmul.f32 0.044715, %v671_v37  ;;  %v672_v2 = vmul.f32 %v656_v39, %v1725_v32  ;;  %v770_v49 = vmul.f32 %v754_v36, %v1630_v54 }
 0x1b6   : > { %1347 = vtanh.f32 %v716_v41  ;;  %v717_v51 = vmul.f32 0.7978846, %v701_v42  ;;  %v756_v53 = vmul.f32 0.5, %v740_v43  ;;  %v753_v55 = vmul.f32 0.5, %v737_v18 }
 0x1b7   : > { %v1336_v57 = vpop.eup %1335  ;;  %v718_v58 = vmul.f32 0.7978846, %v702_v45  ;;  %v703_v61 = vadd.f32 %v687_v46, %v1717_v23  ;;  %v688_v62 = vmul.f32 0.044715, %v672_v2  ;;  %v755_v63 = vmul.f32 0.5, %v739_v40 }
 0x1b8   : > { %v1338_v3 = vpop.eup %1337  ;;  %1349 = vtanh.f32 %v717_v51  ;;  %v772_v6 = vmul.f32 %v756_v53, %v1642_v0  ;;  %v769_v52 = vmul.f32 %v753_v55, %v1625_v50  ;;  %v742_v7 = vadd.f32 1.0, %v1336_v57 }
 0x1b9   : > { %1351 = vtanh.f32 %v718_v58  ;;  %v719_v8 = vmul.f32 0.7978846, %v703_v61  ;;  %v704_v54 = vadd.f32 %v688_v62, %v1725_v32  ;;  %v771_v9 = vmul.f32 %v755_v63, %v1636_v59 }
 0x1ba   : > { %v1340_v10 = vpop.eup %1339  ;;  %v786_v15 = vpack.c.bf16 %v772_v6, %v770_v49  ;;  %v758_v16 = vmul.f32 0.5, %v742_v7  ;;  %v741_v11 = vadd.f32 1.0, %v1334_v48  ;;  %v743_v5 = vadd.f32 1.0, %v1338_v3 }
 0x1bb   : > { %1353 = vtanh.f32 %v719_v8  ;;  %v720_v18 = vmul.f32 0.7978846, %v704_v54  ;;  %v785_v21 = vpack.c.bf16 %v771_v9, %v769_v52  ;;  %v744_v14 = vadd.f32 1.0, %v1340_v10  ;;  %v1130_v8 = vld [vmem:[%s1775_s6] ss:$0 sm:$0xff] }
 0x1bc   : > { %v1342_v13 = vpop.eup %1341  ;;  %960 = vmatprep.mubr.bf16.mxu1 %v786_v15  ;;  %v759_v0 = vmul.f32 0.5, %v743_v5  ;;  %v757_v24 = vmul.f32 0.5, %v741_v11  ;;  %v774_v26 = vmul.f32 %v758_v16, %v1656_v17 }
 0x1bd   : > { %1355 = vtanh.f32 %v720_v18  ;;  %961 = vmatmul.mubr.bf16.vlgmr.msra.gmra.mxu1 %v785_v21  ;;  %v760_v50 = vmul.f32 0.5, %v744_v14  ;;  %v745_v33 = vadd.f32 1.0, %v1342_v13 }
 0x1be   : > { %v1344_v25 = vpop.eup %1343  ;;  %v775_v28 = vmul.f32 %v759_v0, %v1660_v19  ;;  %v773_v22 = vmul.f32 %v757_v24, %v1649_v4 }
 0x1bf   : > { %v776_v59 = vmul.f32 %v760_v50, %v1669_v27  ;;  %v746_v30 = vadd.f32 1.0, %v1344_v25  ;;  %v761_v17 = vmul.f32 0.5, %v745_v33 }
 0x1c0   : > { %v787_v36 = vpack.c.bf16 %v775_v28, %v773_v22 }
 0x1c1   : > { %v1346_v20 = vpop.eup %1345  ;;  %v788_v29 = vpack.c.bf16 %v776_v59, %v774_v26  ;;  %v762_v35 = vmul.f32 0.5, %v746_v30  ;;  %v777_v48 = vmul.f32 %v761_v17, %v1676_v1 }
 0x1c2   : > { %v747_v47 = vadd.f32 1.0, %v1346_v20 }
 0x1c3   : > { %v1348_v34 = vpop.eup %1347  ;;  %968 = vmatprep.mubr.bf16.mxu1 %v788_v29  ;;  %v778_v43 = vmul.f32 %v762_v35, %v1683_v38 }
 0x1c4   : > { %v748_v31 = vadd.f32 1.0, %v1348_v34  ;;  %v763_v37 = vmul.f32 0.5, %v747_v47 }
 0x1c5   : > { %v1350_v39 = vpop.eup %1349  ;;  %969 = vmatmul.mubr.bf16.gmra.mxu1 %v787_v36 }
 0x1c6   : > { %v1352_v40 = vpop.eup %1351  ;;  %v764_v27 = vmul.f32 0.5, %v748_v31  ;;  %v779_v19 = vmul.f32 %v763_v37, %v1691_v44  ;;  %v749_v45 = vadd.f32 1.0, %v1350_v39 }
 0x1c7   : > { %v750_v41 = vadd.f32 1.0, %v1352_v40 }
 0x1c8   : > { %v1354_v42 = vpop.eup %1353  ;;  %v780_v4 = vmul.f32 %v764_v27, %v1698_v60  ;;  %v789_v51 = vpack.c.bf16 %v779_v19, %v777_v48  ;;  %v765_v44 = vmul.f32 0.5, %v749_v45 }
 0x1c9   : > { %v751_v46 = vadd.f32 1.0, %v1354_v42  ;;  %v766_v55 = vmul.f32 0.5, %v750_v41 }
 0x1ca   : > { %v1356_v2 = vpop.eup %1355  ;;  %v790_v49 = vpack.c.bf16 %v780_v4, %v778_v43  ;;  %v781_v62 = vmul.f32 %v765_v44, %v1705_v56 }
 0x1cb   : > { %v752_v53 = vadd.f32 1.0, %v1356_v2  ;;  %v767_v57 = vmul.f32 0.5, %v751_v46  ;;  %v782_v61 = vmul.f32 %v766_v55, %v1709_v12 }
 0x1cc   : > { %976 = vmatprep.mubr.bf16.mxu1 %v790_v49 }
 0x1cd   : > { %977 = vmatmul.mubr.bf16.gmra.mxu1 %v789_v51  ;;  %v768_v58 = vmul.f32 0.5, %v752_v53  ;;  %v783_v60 = vmul.f32 %v767_v57, %v1717_v23 }
 0x1cf   : > { %v784_v38 = vmul.f32 %v768_v58, %v1725_v32  ;;  %v791_v63 = vpack.c.bf16 %v783_v60, %v781_v62 }
 0x1d1   : > { %v792_v1 = vpack.c.bf16 %v784_v38, %v782_v61 }
 0x1d3   : > { %984 = vmatprep.mubr.bf16.mxu1 %v792_v1 }
 0x1d5   : > { %985 = vmatmul.mubr.bf16.gmra.mxu1 %v791_v63 }
 0x27d   : > { %v1223_v3 = vpop.f32.mrf.mxu1 }
 0x27f   : > { %v1224_v6 = vpop.f32.mrf.mxu1 }
 0x280   : > { %v1225_v7 = vadd.f32 %v1224_v6, %v1223_v3 }
 0x281   : > { %v1226_v52 = vpop.f32.mrf.mxu1 }
 0x282   : > { %v963_v9 = vadd.f32 %v1225_v7, %v1130_v8 }
 0x283   : > { %v1227_v12 = vpop.f32.mrf.mxu1 }
 0x284   : > { %v1228_v54 = vadd.f32 %v1227_v12, %v1226_v52 }
 0x285   : > { %v1229_v32 = vpop.f32.mrf.mxu1 }
 0x286   : > { %v966_v23 = vadd.f32 %v1228_v54, %v1130_v8 }
 0x287   : > { %v1230_v56 = vpop.f32.mrf.mxu1 }
 0x288   : > { %v1184_v10 = vpack.c.bf16 %v966_v23, %v963_v9  ;;  %v1231_v16 = vadd.f32 %v1230_v56, %v1229_v32 }
 0x289   : > { %v1232_v15 = vpop.f32.mrf.mxu1 }
 0x28a   : > { %1185 = vst [vmem:[%s1760_s19] sm:$0xff] %v1184_v10   ;;  %v971_v21 = vadd.f32 %v1231_v16, %v1130_v8 }
 0x28b   : > { %v1233_v11 = vpop.f32.mrf.mxu1 }
 0x28c   : > { %v1234_v5 = vadd.f32 %v1233_v11, %v1232_v15 }
 0x28d   : > { %v1235_v18 = vpop.f32.mrf.mxu1 }
 0x28e   : > { %v974_v14 = vadd.f32 %v1234_v5, %v1130_v8 }
 0x28f   : > { %v1236_v13 = vpop.f32.mrf.mxu1 }
 0x290   : > { %v1189_v0 = vpack.c.bf16 %v974_v14, %v971_v21  ;;  %v1237_v24 = vadd.f32 %v1236_v13, %v1235_v18 }
 0x291   : > { %v1238_v50 = vpop.f32.mrf.mxu1 }
 0x292   : > { %1204 = vst [vmem:[%s1760_s19 + $0x8] sm:$0xff] %v1189_v0   ;;  %v979_v28 = vadd.f32 %v1237_v24, %v1130_v8 }
 0x293   : > { %v1239_v25 = vpop.f32.mrf.mxu1 }
 0x294   : > { %v1240_v26 = vadd.f32 %v1239_v25, %v1238_v50 }
 0x295   : > { %v1241_v59 = vpop.f32.mrf.mxu1 }
 0x296   : > { %v982_v30 = vadd.f32 %v1240_v26, %v1130_v8 }
 0x297   : > { %v1242_v20 = vpop.f32.mrf.mxu1 }
 0x298   : > { %v1194_v29 = vpack.c.bf16 %v982_v30, %v979_v28  ;;  %v1243_v33 = vadd.f32 %v1242_v20, %v1241_v59 }
 0x299   : > { %v1244_v22 = vpop.f32.mrf.mxu1 }
 0x29a   : > { %1205 = vst [vmem:[%s1760_s19 + $0x10] sm:$0xff] %v1194_v29   ;;  %v987_v36 = vadd.f32 %v1243_v33, %v1130_v8 }
 0x29b   : > { %v1245_v47 = vpop.f32.mrf.mxu1 }
 0x29c   : > { %v1246_v34 = vadd.f32 %v1245_v47, %v1244_v22 }
 0x29e   : > { %v990_v31 = vadd.f32 %v1246_v34, %v1130_v8 }
 0x2a0   : > { %v1199_v35 = vpack.c.bf16 %v990_v31, %v987_v36 }
 0x2a2   : > { %1206 = vst [vmem:[%s1760_s19 + $0x18] sm:$0xff] %v1199_v35  }
 0x2a3 PF: > { %s18_s24 = sadd.s32 1, %s1393_s24  }
 0x2a4   : > { %p15_p1 = scmp.ge.s32.totalorder %s18_s24, 4  }
 0x2a6   :  { %17 = sbr.rel (!%p15_p1) target bundleno = 1 (0x1), region = 83 }
 0x2ab   :  { %1055 = vsyncpa [#allocation3], 1 }
 0x2ac   :  { %1057 = vsyncpa [#allocation3 + $0x1], 1 }

</bundles_post_ra>
